<compile_context>
chip_gen: v6e
topology: v6e:2x2x1
jax: 0.10.0
libtpu: 0.0.40
codegen_flags: <defaults>
</compile_context>

<pallas_src>
import functools

import jax
import jax.numpy as jnp
from jax.experimental import pallas as pl
from jax.experimental.pallas import tpu as pltpu

CIN, COUT, KH, KW = 3, 253, 3, 3      # Conv2d(3, 256-3, 3)
EPS = 1e-5
K = KH * KW * CIN                     # 27
K_PAD = 32                            # small contraction pad; do NOT chase MXU depth
COUT_PAD = 256                        # lane-dense output (multiple of 128)


def _round_up(x, m):
    return (x + m - 1) // m * m


def _fused_conv_bn_kernel(p_ref, w_ref, o_ref, *, m_valid):
    # conv (im2col matmul, bf16 inputs / f32 accumulation) + BN (batch stats,
    # gamma=1, beta=0) + (v1 + v1) == *2, all on one VMEM-resident block.
    y = jnp.dot(p_ref[...], w_ref[...], preferred_element_type=jnp.float32)

    # One-pass per-channel statistics. Padded im2col rows are exactly zero
    # (and there is no bias), so they contribute nothing to either sum;
    # dividing by the true row count m_valid yields the batch statistics
    # with no row mask needed.
    inv_m = 1.0 / float(m_valid)
    s1 = jnp.sum(y, axis=0, keepdims=True)
    s2 = jnp.sum(y * y, axis=0, keepdims=True)
    mean = s1 * inv_m
    var = jnp.maximum(s2 * inv_m - mean * mean, 0.0)   # clamp keeps var >= 0

    # Fold the (v1 + v1) == *2 into the per-channel scale; single fused
    # scale/shift pass over the (M_PAD, COUT_PAD) block at the store.
    scale = 2.0 * jax.lax.rsqrt(var + EPS)             # (1, COUT_PAD)
    shift = mean * scale                               # (1, COUT_PAD)
    o_ref[...] = y * scale - shift


def conv_bn_forward(x_nchw, w_oihw, bias):
    del bias  # cancelled exactly by BN's per-channel batch-mean subtraction
    N, C, H, W = x_nchw.shape
    assert C == CIN
    OH, OW = H - KH + 1, W - KW + 1
    M = N * OH * OW
    # 16-row alignment: enough for the bf16 LHS sublane packing and the f32
    # output (needs 8); far less padding than rounding to 128.
    M_PAD = _round_up(M, 16)

    x = jnp.transpose(x_nchw, (0, 2, 3, 1))  # -> NHWC (glue)

    # im2col patches: (M, K) with (kh, kw, cin) ordering, cin fastest.
    # The slice/concat/pad/cast chain below is tiny (~6 KiB input) and is
    # left to XLA fusion; ordering matches the weight transpose below.
    cols = [x[:, i:i + OH, j:j + OW, :] for i in range(KH) for j in range(KW)]
    patches = jnp.concatenate(cols, axis=-1).reshape(M, K)
    patches_p = jnp.pad(
        patches, ((0, M_PAD - M), (0, K_PAD - K))
    ).astype(jnp.bfloat16)

    # PyTorch weight (Cout, Cin, KH, KW) -> (KH, KW, Cin, Cout) -> (K, Cout),
    # zero-padded to (K_PAD, COUT_PAD).
    w = jnp.transpose(w_oihw, (2, 3, 1, 0)).reshape(K, COUT)
    w_p = jnp.pad(
        w, ((0, K_PAD - K), (0, COUT_PAD - COUT))
    ).astype(jnp.bfloat16)

    kernel = functools.partial(_fused_conv_bn_kernel, m_valid=M)

    out_pad = pl.pallas_call(
        kernel,
        out_shape=jax.ShapeDtypeStruct((M_PAD, COUT_PAD), jnp.float32),
        grid_spec=pltpu.PrefetchScalarGridSpec(
            num_scalar_prefetch=0,
            grid=(1,),  # single step: whole problem fits trivially in VMEM
            in_specs=[
                pl.BlockSpec((M_PAD, K_PAD), lambda i: (0, 0)),
                pl.BlockSpec((K_PAD, COUT_PAD), lambda i: (0, 0)),
            ],
            out_specs=pl.BlockSpec((M_PAD, COUT_PAD), lambda i: (0, 0)),
        ),
        compiler_params=pltpu.CompilerParams(
            dimension_semantics=("arbitrary",)),
    )(patches_p, w_p)

    # Padded rows/channels carry garbage (-mean*scale); slice them off here.
    out = out_pad[:M, :COUT].reshape(N, OH, OW, COUT)
    return jnp.transpose(out, (0, 3, 1, 2))  # back to NCHW to match the module


if __name__ == "__main__":
    key = jax.random.PRNGKey(0)
    kx, kw, kb = jax.random.split(key, 3)

    # Small shapes consistent with the module: N=2, Cin=3, H=W=16.
    x = jax.random.normal(kx, (2, CIN, 16, 16), dtype=jnp.float32)

    # Deterministic PyTorch-default-style init: U(-1/sqrt(fan_in), 1/sqrt(fan_in))
    fan_in = CIN * KH * KW
    bound = 1.0 / (fan_in ** 0.5)
    w_oihw = jax.random.uniform(kw, (COUT, CIN, KH, KW), jnp.float32,
                                minval=-bound, maxval=bound)
    bias = jax.random.uniform(kb, (COUT,), jnp.float32,
                              minval=-bound, maxval=bound)

    out = jax.jit(conv_bn_forward)(x, w_oihw, bias)
    jax.block_until_ready(out)
    assert out.shape == (2, COUT, 14, 14), out.shape
    assert bool(jnp.all(jnp.isfinite(out)))
    print("KERNEL_OK")
</pallas_src>

<mosaic_0001>
module attributes {stable_mosaic.version = 11 : i64} {
  func.func @_fused_conv_bn_kernel(%arg0: i32, %arg1: memref<400x32xbf16, #tpu.memory_space<vmem>>, %arg2: memref<32x256xbf16, #tpu.memory_space<vmem>>, %arg3: memref<400x256xf32, #tpu.memory_space<vmem>>) attributes {dimension_semantics = [#tpu.dimension_semantics<arbitrary>], iteration_bounds = array<i64: 1>, scalar_prefetch = 0 : i64, scratch_operands = 0 : i64, tpu.core_type = #tpu.core_type<tc>, window_params = [{pipeline_mode = #tpu.pipeline_mode<synchronous>, transform_indices = @transform_0, window_bounds = array<i64: 400, 32>}, {pipeline_mode = #tpu.pipeline_mode<synchronous>, transform_indices = @transform_1, window_bounds = array<i64: 32, 256>}, {pipeline_mode = #tpu.pipeline_mode<synchronous>, transform_indices = @transform_2, window_bounds = array<i64: 400, 256>}]} {
    %c0 = arith.constant 0 : index
    %c0_0 = arith.constant 0 : index
    %0 = vector.load %arg1[%c0, %c0_0] : memref<400x32xbf16, #tpu.memory_space<vmem>>, vector<400x32xbf16>
    %c0_1 = arith.constant 0 : index
    %c0_2 = arith.constant 0 : index
    %1 = vector.load %arg2[%c0_1, %c0_2] : memref<32x256xbf16, #tpu.memory_space<vmem>>, vector<32x256xbf16>
    %cst = arith.constant dense<0.000000e+00> : vector<400x256xf32>
    %2 = tpu.matmul %0, %1, %cst {dimension_numbers = #tpu.dot_dimension_numbers<[1], [0], [0], [1], [0, 0, 1, 1], [], []>} : vector<400x32xbf16>, vector<32x256xbf16>, vector<400x256xf32> -> vector<400x256xf32>
    %cst_3 = arith.constant dense<0.000000e+00> : vector<256xf32>
    %3 = vector.multi_reduction <add>, %2, %cst_3 [0] : vector<400x256xf32> to vector<256xf32>
    %4 = vector.shape_cast %3 : vector<256xf32> to vector<1x256xf32>
    %5 = arith.mulf %2, %2 : vector<400x256xf32>
    %cst_4 = arith.constant dense<0.000000e+00> : vector<256xf32>
    %6 = vector.multi_reduction <add>, %5, %cst_4 [0] : vector<400x256xf32> to vector<256xf32>
    %7 = vector.shape_cast %6 : vector<256xf32> to vector<1x256xf32>
    %cst_5 = arith.constant 0.00255102036 : f32
    %8 = vector.broadcast %cst_5 : f32 to vector<1x256xf32>
    %9 = arith.mulf %4, %8 : vector<1x256xf32>
    %cst_6 = arith.constant 0.00255102036 : f32
    %10 = vector.broadcast %cst_6 : f32 to vector<1x256xf32>
    %11 = arith.mulf %7, %10 : vector<1x256xf32>
    %12 = arith.mulf %9, %9 : vector<1x256xf32>
    %13 = arith.subf %11, %12 : vector<1x256xf32>
    %cst_7 = arith.constant 0.000000e+00 : f32
    %14 = vector.broadcast %cst_7 : f32 to vector<1x256xf32>
    %15 = arith.maximumf %13, %14 : vector<1x256xf32>
    %cst_8 = arith.constant 9.99999974E-6 : f32
    %16 = vector.broadcast %cst_8 : f32 to vector<1x256xf32>
    %17 = arith.addf %15, %16 : vector<1x256xf32>
    %18 = math.rsqrt %17 : vector<1x256xf32>
    %cst_9 = arith.constant 2.000000e+00 : f32
    %19 = vector.broadcast %cst_9 : f32 to vector<1x256xf32>
    %20 = arith.mulf %19, %18 : vector<1x256xf32>
    %21 = arith.mulf %9, %20 : vector<1x256xf32>
    %22 = vector.broadcast %20 : vector<1x256xf32> to vector<400x256xf32>
    %23 = arith.mulf %2, %22 : vector<400x256xf32>
    %24 = vector.broadcast %21 : vector<1x256xf32> to vector<400x256xf32>
    %25 = arith.subf %23, %24 : vector<400x256xf32>
    %c0_10 = arith.constant 0 : index
    %c0_11 = arith.constant 0 : index
    %26 = vector.load %arg3[%c0_10, %c0_11] : memref<400x256xf32, #tpu.memory_space<vmem>>, vector<400x256xf32>
    tpu.vector_store %arg3[%c0_10, %c0_11], %25 {strides = array<i32>} : memref<400x256xf32, #tpu.memory_space<vmem>>, vector<400x256xf32>,
    return
  }
  func.func @transform_0(%arg0: i32) -> (i32, i32) {
    %c0_i32 = arith.constant 0 : i32
    %c0_i32_0 = arith.constant 0 : i32
    %c0_i32_1 = arith.constant 0 : i32
    return %c0_i32, %c0_i32_0 : i32, i32
  }
  func.func @transform_1(%arg0: i32) -> (i32, i32) {
    %c0_i32 = arith.constant 0 : i32
    %c0_i32_0 = arith.constant 0 : i32
    %c0_i32_1 = arith.constant 0 : i32
    return %c0_i32, %c0_i32_0 : i32, i32
  }
  func.func @transform_2(%arg0: i32) -> (i32, i32) {
    %c0_i32 = arith.constant 0 : i32
    %c0_i32_0 = arith.constant 0 : i32
    %c0_i32_1 = arith.constant 0 : i32
    return %c0_i32, %c0_i32_0 : i32, i32
  }
}

</mosaic_0001>

<bundles_post_ra>
// kernel: conv_bn_forward.1
= control target key start
LH: loop header
LB: loop body
LE: loop exit
PB: predicated region body
PF: predicated region fallthrough
CT: control target
= control target key end

     0   :  { %v1306_v1 = vmov 0   ;;  %vm211_vm0 = vcmask 261120   ;;  %s2765_s1 = inlined_call_operand.vmem [shape: bf16[32,256], index: 1, kind: input, shape index: {}]   ;;  %s2766_s0 = inlined_call_operand.vmem [shape: bf16[400,32], index: 0, kind: input, shape index: {}]   ;;  %s2767_s2 = inlined_call_operand.vmem [shape: f32[400,256], index: 2, kind: output, shape index: {}]  }
   0x1   :  { %v1271_v0 = vld [vmem:[%s2765_s1 + $0x14] ss:$8 sps:$4 sm:$0xff]   ;;  %319 = vmatprep.mubr.bf16.mxu0 %v1306_v1  ;;  %449 = vmatprep.mubr.bf16.mxu1 %v1306_v1  ;;  %v1273_v2 = vld [vmem:[%s2765_s1 + $0x10] ss:$8 sps:$4 sm:$0xff]   ;;  %v1274_v3 = vld [vmem:[%s2765_s1 + $0x4] ss:$8 sps:$4 sm:$0xff]  }
   0x2   :  { %299 = vmatprep.subr.bf16.mxu0 %v1271_v0  ;;  %1266 = vmatprep.subr.bf16.mxu1 %v1271_v0  ;;  %v1276_v4 = vld [vmem:[%s2765_s1] ss:$8 sps:$4 sm:$0xff]   ;;  %v1286_v8 = vld [vmem:[%s2766_s0 + $0x70] sm:$0xff]   ;;  %v1288_v10 = vld [vmem:[%s2766_s0 + $0x78] sm:$0xff]  }
   0x3   :  { %300 = vmatpush1.bf16.msra.mxu0 %v1273_v2  ;;  %1268 = vmatpush1.bf16.msra.mxu1 %v1273_v2  ;;  %v1277_v5 = vld [vmem:[%s2766_s0] sm:$0xff]   ;;  %v1284_v6 = vld [vmem:[%s2766_s0 + $0x68] sm:$0xff]   ;;  %v1279_v9 = vld [vmem:[%s2766_s0 + $0x10] sm:$0xff]  }
   0x4   :  { %301 = vmatprep.subr.bf16.mxu0 %v1274_v3  ;;  %1267 = vmatprep.subr.bf16.mxu1 %v1274_v3  ;;  %v1278_v7 = vld [vmem:[%s2766_s0 + $0x8] sm:$0xff]   ;;  %v1280_v11 = vld [vmem:[%s2766_s0 + $0x18] sm:$0xff]   ;;  %v1290_v12 = vld [vmem:[%s2766_s0 + $0x80] sm:$0xff]  }
   0x5   :  { %v1281_v13 = vld [vmem:[%s2766_s0 + $0x20] sm:$0xff]   ;;  %v1292_v14 = vld [vmem:[%s2766_s0 + $0x88] sm:$0xff]   ;;  %v1294_v16 = vld [vmem:[%s2766_s0 + $0x90] sm:$0xff]  }
   0x6   :  { %v1282_v15 = vld [vmem:[%s2766_s0 + $0x28] sm:$0xff]   ;;  %v1283_v17 = vld [vmem:[%s2766_s0 + $0x30] sm:$0xff]   ;;  %v1296_v18 = vld [vmem:[%s2766_s0 + $0x98] sm:$0xff]  }
   0x7   :  { %302 = vmatpush1.bf16.msra.mxu0 %v1276_v4  ;;  %1269 = vmatpush1.bf16.msra.mxu1 %v1276_v4  ;;  %v1285_v19 = vld [vmem:[%s2766_s0 + $0x38] sm:$0xff]   ;;  %v1297_v20 = vld [vmem:[%s2766_s0 + $0xa0] sm:$0xff]   ;;  %v1298_v22 = vld [vmem:[%s2766_s0 + $0xa8] sm:$0xff]  }
   0x8   :  { %v1287_v21 = vld [vmem:[%s2766_s0 + $0x40] sm:$0xff]   ;;  %v1289_v23 = vld [vmem:[%s2766_s0 + $0x48] sm:$0xff]   ;;  %v1299_v24 = vld [vmem:[%s2766_s0 + $0xb0] sm:$0xff]  }
   0x9   :  { %v1291_v25 = vld [vmem:[%s2766_s0 + $0x50] sm:$0xff]   ;;  %v1300_v26 = vld [vmem:[%s2766_s0 + $0xb8] sm:$0xff]   ;;  %v1301_v28 = vld [vmem:[%s2766_s0 + $0xc0] sm:$0xff]  }
   0xa   :  { %1241 = vmatmul.mubr.msk.bf16.vlgmr.msra.gmra.mxu0 %vm211_vm0, %v1277_v5  ;;  %1254 = vmatmul.mubr.msk.bf16.vlgmr.msra.gmra.mxu1 %vm211_vm0, %v1284_v6  ;;  %v1293_v27 = vld [vmem:[%s2766_s0 + $0x58] sm:$0xff]   ;;  %v1295_v29 = vld [vmem:[%s2766_s0 + $0x60] sm:$0xff]  }
   0xb   :  { %329 = vmatprep.mubr.bf16.mxu0 %v1306_v1  ;;  %459 = vmatprep.mubr.bf16.mxu1 %v1306_v1 }
  0x12   :  { %1242 = vmatmul.mubr.msk.bf16.gmra.mxu0 %vm211_vm0, %v1278_v7  ;;  %1255 = vmatmul.mubr.msk.bf16.gmra.mxu1 %vm211_vm0, %v1286_v8 }
  0x13   :  { %339 = vmatprep.mubr.bf16.mxu0 %v1306_v1  ;;  %469 = vmatprep.mubr.bf16.mxu1 %v1306_v1 }
  0x1a   :  { %1243 = vmatmul.mubr.msk.bf16.gmra.mxu0 %vm211_vm0, %v1279_v9  ;;  %1256 = vmatmul.mubr.msk.bf16.gmra.mxu1 %vm211_vm0, %v1288_v10 }
  0x1b   :  { %349 = vmatprep.mubr.bf16.mxu0 %v1306_v1  ;;  %479 = vmatprep.mubr.bf16.mxu1 %v1306_v1 }
  0x22   :  { %1244 = vmatmul.mubr.msk.bf16.gmra.mxu0 %vm211_vm0, %v1280_v11  ;;  %1257 = vmatmul.mubr.msk.bf16.gmra.mxu1 %vm211_vm0, %v1290_v12 }
  0x23   :  { %359 = vmatprep.mubr.bf16.mxu0 %v1306_v1  ;;  %489 = vmatprep.mubr.bf16.mxu1 %v1306_v1 }
  0x2a   :  { %1245 = vmatmul.mubr.msk.bf16.gmra.mxu0 %vm211_vm0, %v1281_v13  ;;  %1258 = vmatmul.mubr.msk.bf16.gmra.mxu1 %vm211_vm0, %v1292_v14 }
  0x2b   :  { %369 = vmatprep.mubr.bf16.mxu0 %v1306_v1  ;;  %499 = vmatprep.mubr.bf16.mxu1 %v1306_v1 }
  0x32   :  { %1246 = vmatmul.mubr.msk.bf16.gmra.mxu0 %vm211_vm0, %v1282_v15  ;;  %1259 = vmatmul.mubr.msk.bf16.gmra.mxu1 %vm211_vm0, %v1294_v16 }
  0x33   :  { %379 = vmatprep.mubr.bf16.mxu0 %v1306_v1  ;;  %509 = vmatprep.mubr.bf16.mxu1 %v1306_v1 }
  0x3a   :  { %1247 = vmatmul.mubr.msk.bf16.gmra.mxu0 %vm211_vm0, %v1283_v17  ;;  %1260 = vmatmul.mubr.msk.bf16.gmra.mxu1 %vm211_vm0, %v1296_v18 }
  0x3b   :  { %389 = vmatprep.mubr.bf16.mxu0 %v1306_v1  ;;  %519 = vmatprep.mubr.bf16.mxu1 %v1306_v1 }
  0x42   :  { %1248 = vmatmul.mubr.msk.bf16.gmra.mxu0 %vm211_vm0, %v1285_v19  ;;  %1261 = vmatmul.mubr.msk.bf16.gmra.mxu1 %vm211_vm0, %v1297_v20 }
  0x43   :  { %399 = vmatprep.mubr.bf16.mxu0 %v1306_v1  ;;  %529 = vmatprep.mubr.bf16.mxu1 %v1306_v1 }
  0x4a   :  { %1249 = vmatmul.mubr.msk.bf16.gmra.mxu0 %vm211_vm0, %v1287_v21  ;;  %1262 = vmatmul.mubr.msk.bf16.gmra.mxu1 %vm211_vm0, %v1298_v22 }
  0x4b   :  { %409 = vmatprep.mubr.bf16.mxu0 %v1306_v1  ;;  %539 = vmatprep.mubr.bf16.mxu1 %v1306_v1 }
  0x52   :  { %1250 = vmatmul.mubr.msk.bf16.gmra.mxu0 %vm211_vm0, %v1289_v23  ;;  %1263 = vmatmul.mubr.msk.bf16.gmra.mxu1 %vm211_vm0, %v1299_v24 }
  0x53   :  { %419 = vmatprep.mubr.bf16.mxu0 %v1306_v1  ;;  %549 = vmatprep.mubr.bf16.mxu1 %v1306_v1 }
  0x5a   :  { %1251 = vmatmul.mubr.msk.bf16.gmra.mxu0 %vm211_vm0, %v1291_v25  ;;  %1264 = vmatmul.mubr.msk.bf16.gmra.mxu1 %vm211_vm0, %v1300_v26 }
  0x5b   :  { %429 = vmatprep.mubr.bf16.mxu0 %v1306_v1  ;;  %559 = vmatprep.mubr.bf16.mxu1 %v1306_v1 }
  0x62   :  { %1252 = vmatmul.mubr.msk.bf16.gmra.mxu0 %vm211_vm0, %v1293_v27  ;;  %1265 = vmatmul.mubr.msk.bf16.gmra.mxu1 %vm211_vm0, %v1301_v28 }
  0x63   :  { %439 = vmatprep.mubr.bf16.mxu0 %v1306_v1 }
  0x6a   :  { %1253 = vmatmul.mubr.msk.bf16.gmra.mxu0 %vm211_vm0, %v1295_v29 }
  0xca   :  { %v1459_v30 = vpop.f32.mrf.mxu0  ;;  %v1463_v32 = vpop.f32.mrf.mxu1 }
  0xcb   :  { %2834 = vst [vmem:[#allocation2_spill] sm:$0xff] %v1459_v30  ;;  %2836 = vst [vmem:[#allocation4_spill] sm:$0xff] %v1463_v32  ;;  %v680_v19 = vmul.f32 %v1459_v30, %v1459_v30 }
  0xcc   :  { %v1461_v31 = vpop.f32.mrf.mxu0  ;;  %v1467_v34 = vpop.f32.mrf.mxu1 }
  0xcd   :  { %2835 = vst [vmem:[#allocation3_spill] sm:$0xff] %v1461_v31  ;;  %v681_v22 = vmul.f32 %v1461_v31, %v1461_v31 }
  0xce   :  { %v1465_v33 = vpop.f32.mrf.mxu0  ;;  %v1471_v36 = vpop.f32.mrf.mxu1 }
  0xcf   :  { %2837 = vst [vmem:[#allocation5_spill] sm:$0xff] %v1465_v33  ;;  %v682_v15 = vmul.f32 %v1465_v33, %v1465_v33  ;;  %v570_v20 = vadd.f32 %v1465_v33, %v1459_v30 }
  0xd0   :  { %v1469_v35 = vpop.f32.mrf.mxu0  ;;  %v1475_v38 = vpop.f32.mrf.mxu1 }
  0xd1   :  { %2838 = vst [vmem:[#allocation6_spill] sm:$0xff] %v1469_v35  ;;  %2840 = vst [vmem:[#allocation8_spill] sm:$0xff] %v1475_v38  ;;  %v683_v17 = vmul.f32 %v1469_v35, %v1469_v35  ;;  %v780_v25 = vadd.f32 %v682_v15, %v680_v19  ;;  %v625_v26 = vadd.f32 %v1469_v35, %v1461_v31 }
  0xd2   :  { %v1473_v37 = vpop.f32.mrf.mxu0  ;;  %v1479_v40 = vpop.f32.mrf.mxu1 }
  0xd3   :  { %2839 = vst [vmem:[#allocation7_spill] sm:$0xff] %v1473_v37  ;;  %v684_v21 = vmul.f32 %v1473_v37, %v1473_v37  ;;  %v571_v27 = vadd.f32 %v570_v20, %v1473_v37  ;;  %v835_v33 = vadd.f32 %v683_v17, %v681_v22 }
  0xd4   :  { %v1477_v39 = vpop.f32.mrf.mxu0  ;;  %v1483_v42 = vpop.f32.mrf.mxu1 }
  0xd5   :  { %2841 = vst [vmem:[#allocation9_spill] sm:$0xff] %v1477_v39  ;;  %v685_v23 = vmul.f32 %v1477_v39, %v1477_v39 }
  0xd6   :  { %v1481_v41 = vpop.f32.mrf.mxu0  ;;  %v1487_v44 = vpop.f32.mrf.mxu1 }
  0xd7   :  { %v686_v28 = vmul.f32 %v1481_v41, %v1481_v41  ;;  %v572_v15 = vadd.f32 %v571_v27, %v1481_v41  ;;  %v836_v20 = vadd.f32 %v835_v33, %v685_v23 }
  0xd8   :  { %v1485_v43 = vpop.f32.mrf.mxu0  ;;  %v1491_v46 = vpop.f32.mrf.mxu1 }
  0xd9   :  { %2842 = vst [vmem:[#allocation10_spill] sm:$0xff] %v1485_v43  ;;  %2844 = vst [vmem:[#allocation12_spill] sm:$0xff] %v1491_v46  ;;  %v687_v30 = vmul.f32 %v1485_v43, %v1485_v43 }
  0xda   :  { %v1489_v45 = vpop.f32.mrf.mxu0  ;;  %v1495_v48 = vpop.f32.mrf.mxu1 }
  0xdb   :  { %2843 = vst [vmem:[#allocation11_spill] sm:$0xff] %v1489_v45  ;;  %v688_v19 = vmul.f32 %v1489_v45, %v1489_v45  ;;  %v573_v37 = vadd.f32 %v572_v15, %v1489_v45 }
  0xdc   :  { %v1493_v47 = vpop.f32.mrf.mxu0  ;;  %v1499_v50 = vpop.f32.mrf.mxu1 }
  0xdd   :  { %2845 = vst [vmem:[#allocation13_spill] sm:$0xff] %v1493_v47  ;;  %2846 = vst [vmem:[#allocation14_spill] sm:$0xff] %v1499_v50  ;;  %v689_v35 = vmul.f32 %v1493_v47, %v1493_v47 }
  0xde   :  { %v1497_v49 = vpop.f32.mrf.mxu0  ;;  %v1503_v52 = vpop.f32.mrf.mxu1 }
  0xe0   :  { %v1501_v51 = vpop.f32.mrf.mxu0  ;;  %v1507_v54 = vpop.f32.mrf.mxu1 }
  0xe1   :  { %2847 = vst [vmem:[#allocation15_spill] sm:$0xff] %v1501_v51  ;;  %2849 = vst [vmem:[#allocation17_spill] sm:$0xff] %v1507_v54  ;;  %v691_v27 = vmul.f32 %v1501_v51, %v1501_v51 }
  0xe2   :  { %v1505_v53 = vpop.f32.mrf.mxu0  ;;  %v1511_v56 = vpop.f32.mrf.mxu1 }
  0xe3   :  { %2848 = vst [vmem:[#allocation16_spill] sm:$0xff] %v1505_v53 }
  0xe4   :  { %v1509_v55 = vpop.f32.mrf.mxu0  ;;  %v1515_v58 = vpop.f32.mrf.mxu1 }
  0xe5   :  { %2850 = vst [vmem:[#allocation18_spill] sm:$0xff] %v1509_v55  ;;  %2851 = vst [vmem:[#allocation19_spill] sm:$0xff] %v1515_v58  ;;  %v693_v15 = vmul.f32 %v1509_v55, %v1509_v55 }
  0xe6   :  { %v1513_v57 = vpop.f32.mrf.mxu0  ;;  %v1519_v60 = vpop.f32.mrf.mxu1 }
  0xe8   :  { %v1517_v59 = vpop.f32.mrf.mxu0  ;;  %v1523_v62 = vpop.f32.mrf.mxu1 }
  0xe9   :  { %2852 = vst [vmem:[#allocation20_spill] sm:$0xff] %v1517_v59  ;;  %2854 = vst [vmem:[#allocation22_spill] sm:$0xff] %v1523_v62 }
  0xea   :  { %v1521_v61 = vpop.f32.mrf.mxu0  ;;  %v1527_v0 = vpop.f32.mrf.mxu1 }
  0xeb   :  { %2853 = vst [vmem:[#allocation21_spill] sm:$0xff] %v1521_v61 }
  0xec   :  { %v1525_v63 = vpop.f32.mrf.mxu0  ;;  %v1531_v2 = vpop.f32.mrf.mxu1 }
  0xed   :  { %2855 = vst [vmem:[#allocation23_spill] sm:$0xff] %v1525_v63  ;;  %2856 = vst [vmem:[#allocation24_spill] sm:$0xff] %v1531_v2 }
  0xee   :  { %v1529_v1 = vpop.f32.mrf.mxu0  ;;  %v1535_v4 = vpop.f32.mrf.mxu1 }
  0xf0   :  { %v1533_v3 = vpop.f32.mrf.mxu0  ;;  %v1539_v6 = vpop.f32.mrf.mxu1 }
  0xf1   :  { %2857 = vst [vmem:[#allocation25_spill] sm:$0xff] %v1533_v3  ;;  %2859 = vst [vmem:[#allocation27_spill] sm:$0xff] %v1539_v6 }
  0xf2   :  { %v1537_v5 = vpop.f32.mrf.mxu0  ;;  %v1543_v8 = vpop.f32.mrf.mxu1 }
  0xf3   :  { %2858 = vst [vmem:[#allocation26_spill] sm:$0xff] %v1537_v5 }
  0xf4   :  { %v1541_v7 = vpop.f32.mrf.mxu0  ;;  %v1547_v10 = vpop.f32.mrf.mxu1 }
  0xf5   :  { %2860 = vst [vmem:[#allocation28_spill] sm:$0xff] %v1541_v7  ;;  %2861 = vst [vmem:[#allocation29_spill] sm:$0xff] %v1547_v10  ;;  %v626_v10 = vadd.f32 %v625_v26, %v1477_v39  ;;  %v837_v26 = vadd.f32 %v836_v20, %v687_v30 }
  0xf6   :  { %v1545_v9 = vpop.f32.mrf.mxu0  ;;  %v1551_v12 = vpop.f32.mrf.mxu1 }
  0xf7   :  { %2863 = vst [vmem:[#allocation31_spill] sm:$0xff] %v1551_v12  ;;  %v781_v12 = vadd.f32 %v780_v25, %v684_v21  ;;  %v627_v22 = vadd.f32 %v626_v10, %v1485_v43  ;;  %v690_v21 = vmul.f32 %v1497_v49, %v1497_v49  ;;  %v692_v10 = vmul.f32 %v1505_v53, %v1505_v53 }
  0xf8   :  { %v1549_v11 = vpop.f32.mrf.mxu0  ;;  %v1559_v16 = vpop.f32.mrf.mxu1 }
  0xf9   :  { %2862 = vst [vmem:[#allocation30_spill] sm:$0xff] %v1549_v11  ;;  %2866 = vst [vmem:[#allocation34_spill] sm:$0xff] %v1559_v16  ;;  %v782_v17 = vadd.f32 %v781_v12, %v686_v28  ;;  %v628_v39 = vadd.f32 %v627_v22, %v1493_v47  ;;  %v574_v12 = vadd.f32 %v573_v37, %v1497_v49 }
  0xfa   :  { %v1553_v13 = vpop.f32.mrf.mxu0  ;;  %v1582_v29 = vpop.f32.mrf.mxu1  ;;  %v838_v28 = vadd.f32 %v837_v26, %v689_v35  ;;  %v695_v22 = vmul.f32 %v1517_v59, %v1517_v59 }
  0xfb   :  { %2864 = vst [vmem:[#allocation32_spill] sm:$0xff] %v1553_v13  ;;  %v783_v23 = vadd.f32 %v782_v17, %v688_v19  ;;  %v629_v20 = vadd.f32 %v628_v39, %v1501_v51  ;;  %v575_v45 = vadd.f32 %v574_v12, %v1505_v53  ;;  %v694_v19 = vmul.f32 %v1513_v57, %v1513_v57 }
  0xfc   :  { %v1555_v14 = vpop.f32.mrf.mxu0  ;;  %v1600_v25 = vpop.f32.mrf.mxu1  ;;  %v839_v37 = vadd.f32 %v838_v28, %v691_v27  ;;  %v696_v39 = vmul.f32 %v1521_v61, %v1521_v61  ;;  %v697_v12 = vmul.f32 %v1525_v63, %v1525_v63 }
  0xfd   :  { %2865 = vst [vmem:[#allocation33_spill] sm:$0xff] %v1555_v14  ;;  %2870 = vst [vmem:[#allocation38_spill] sm:$0xff] %v1600_v25  ;;  %v784_v30 = vadd.f32 %v783_v23, %v690_v21  ;;  %v630_v47 = vadd.f32 %v629_v20, %v1509_v55  ;;  %v576_v21 = vadd.f32 %v575_v45, %v1513_v57 }
  0xfe   :  { %v1563_v18 = vpop.f32.mrf.mxu0  ;;  %v1618_v17 = vpop.f32.mrf.mxu1  ;;  %v840_v23 = vadd.f32 %v839_v37, %v693_v15  ;;  %v699_v20 = vmul.f32 %v1533_v3, %v1533_v3 }
  0xff   :  { %v785_v26 = vadd.f32 %v784_v30, %v692_v10  ;;  %v631_v28 = vadd.f32 %v630_v47, %v1517_v59  ;;  %v577_v53 = vadd.f32 %v576_v21, %v1521_v61  ;;  %v698_v10 = vmul.f32 %v1529_v1, %v1529_v1 }
 0x100   :  { %v1575_v24 = vpop.f32.mrf.mxu0  ;;  %v1636_v30 = vpop.f32.mrf.mxu1  ;;  %v841_v45 = vadd.f32 %v840_v23, %v695_v22  ;;  %v700_v47 = vmul.f32 %v1537_v5, %v1537_v5  ;;  %v701_v21 = vmul.f32 %v1541_v7, %v1541_v7 }
 0x101   :  { %2867 = vst [vmem:[#allocation35_spill] sm:$0xff] %v1575_v24  ;;  %v786_v27 = vadd.f32 %v785_v26, %v694_v19  ;;  %2874 = vst [vmem:[#allocation42_spill] sm:$0xff] %v1636_v30  ;;  %v632_v55 = vadd.f32 %v631_v28, %v1525_v63  ;;  %v578_v19 = vadd.f32 %v577_v53, %v1529_v1 }
 0x102   :  { %v1586_v16 = vpop.f32.mrf.mxu0  ;;  %v842_v26 = vadd.f32 %v841_v45, %v697_v12  ;;  %v703_v28 = vmul.f32 %v1549_v11, %v1549_v11 }
 0x103   :  { %2868 = vst [vmem:[#allocation36_spill] sm:$0xff] %v1586_v16  ;;  %v787_v37 = vadd.f32 %v786_v27, %v696_v39  ;;  %v633_v23 = vadd.f32 %v632_v55, %v1533_v3  ;;  %v579_v61 = vadd.f32 %v578_v19, %v1537_v5  ;;  %v702_v39 = vmul.f32 %v1545_v9, %v1545_v9  ;;  %v1654_v27 = vpop.f32.mrf.mxu1 }
 0x104   :  { %v1594_v31 = vpop.f32.mrf.mxu0  ;;  %v843_v53 = vadd.f32 %v842_v26, %v699_v20  ;;  %v704_v55 = vmul.f32 %v1553_v13, %v1553_v13  ;;  %v705_v19 = vmul.f32 %v1555_v14, %v1555_v14 }
 0x105   :  { %2869 = vst [vmem:[#allocation37_spill] sm:$0xff] %v1594_v31  ;;  %v788_v22 = vadd.f32 %v787_v37, %v698_v10  ;;  %v634_v63 = vadd.f32 %v633_v23, %v1541_v7  ;;  %v580_v10 = vadd.f32 %v579_v61, %v1545_v9  ;;  %v707_v23 = vmul.f32 %v1575_v24, %v1575_v24 }
 0x106   :  { %v1604_v33 = vpop.f32.mrf.mxu0  ;;  %v844_v37 = vadd.f32 %v843_v53, %v701_v21 }
 0x107   :  { %v789_v45 = vadd.f32 %v788_v22, %v700_v47  ;;  %v635_v26 = vadd.f32 %v634_v63, %v1549_v11  ;;  %v581_v5 = vadd.f32 %v580_v10, %v1553_v13  ;;  %v706_v47 = vmul.f32 %v1563_v18, %v1563_v18  ;;  %v1672_v22 = vpop.f32.mrf.mxu1 }
 0x108   :  { %v1612_v43 = vpop.f32.mrf.mxu0  ;;  %2878 = vst [vmem:[#allocation46_spill] sm:$0xff] %v1672_v22  ;;  %v845_v61 = vadd.f32 %v844_v37, %v703_v28  ;;  %v708_v63 = vmul.f32 %v1586_v16, %v1586_v16  ;;  %v709_v10 = vmul.f32 %v1594_v31, %v1594_v31 }
 0x109   :  { %2871 = vst [vmem:[#allocation39_spill] sm:$0xff] %v1612_v43  ;;  %v790_v20 = vadd.f32 %v789_v45, %v702_v39  ;;  %v636_v7 = vadd.f32 %v635_v26, %v1555_v14  ;;  %v582_v39 = vadd.f32 %v581_v5, %v1563_v18  ;;  %v711_v26 = vmul.f32 %v1612_v43, %v1612_v43 }
 0x10a   :  { %v1622_v35 = vpop.f32.mrf.mxu0  ;;  %v846_v45 = vadd.f32 %v845_v61, %v705_v19 }
 0x10b   :  { %2872 = vst [vmem:[#allocation40_spill] sm:$0xff] %v1622_v35  ;;  %v791_v53 = vadd.f32 %v790_v20, %v704_v55  ;;  %v637_v37 = vadd.f32 %v636_v7, %v1575_v24  ;;  %v583_v13 = vadd.f32 %v582_v39, %v1586_v16  ;;  %v710_v55 = vmul.f32 %v1604_v33, %v1604_v33  ;;  %v1690_v20 = vpop.f32.mrf.mxu1 }
 0x10c   :  { %v1630_v51 = vpop.f32.mrf.mxu0  ;;  %v847_v5 = vadd.f32 %v846_v45, %v707_v23  ;;  %v712_v7 = vmul.f32 %v1622_v35, %v1622_v35 }
 0x10d   :  { %2873 = vst [vmem:[#allocation41_spill] sm:$0xff] %v1630_v51  ;;  %v792_v28 = vadd.f32 %v791_v53, %v706_v47  ;;  %v638_v14 = vadd.f32 %v637_v37, %v1594_v31  ;;  %v584_v47 = vadd.f32 %v583_v13, %v1604_v33  ;;  %v713_v39 = vmul.f32 %v1630_v51, %v1630_v51 }
 0x10e   :  { %v1640_v15 = vpop.f32.mrf.mxu0  ;;  %v848_v53 = vadd.f32 %v847_v5, %v709_v10 }
 0x10f   :  { %v793_v61 = vadd.f32 %v792_v28, %v708_v63  ;;  %v639_v45 = vadd.f32 %v638_v14, %v1612_v43  ;;  %v585_v16 = vadd.f32 %v584_v47, %v1622_v35  ;;  %v714_v63 = vmul.f32 %v1640_v15, %v1640_v15  ;;  %v1708_v28 = vpop.f32.mrf.mxu1 }
 0x110   :  { %v1648_v59 = vpop.f32.mrf.mxu0  ;;  %2882 = vst [vmem:[#allocation50_spill] sm:$0xff] %v1708_v28  ;;  %v849_v13 = vadd.f32 %v848_v53, %v711_v26 }
 0x111   :  { %2875 = vst [vmem:[#allocation43_spill] sm:$0xff] %v1648_v59  ;;  %v794_v23 = vadd.f32 %v793_v61, %v710_v55  ;;  %v715_v37 = vmul.f32 %v1648_v59, %v1648_v59  ;;  %v640_v31 = vadd.f32 %v639_v45, %v1630_v51  ;;  %v586_v55 = vadd.f32 %v585_v16, %v1640_v15 }
 0x112   :  { %v1658_v12 = vpop.f32.mrf.mxu0  ;;  %v850_v61 = vadd.f32 %v849_v13, %v713_v39 }
 0x113   :  { %2876 = vst [vmem:[#allocation44_spill] sm:$0xff] %v1658_v12  ;;  %v795_v5 = vadd.f32 %v794_v23, %v712_v7  ;;  %v716_v14 = vmul.f32 %v1658_v12, %v1658_v12  ;;  %v641_v53 = vadd.f32 %v640_v31, %v1648_v59  ;;  %v587_v35 = vadd.f32 %v586_v55, %v1658_v12  ;;  %v1726_v23 = vpop.f32.mrf.mxu1 }
 0x114   :  { %v1666_v3 = vpop.f32.mrf.mxu0  ;;  %v851_v16 = vadd.f32 %v850_v61, %v715_v37 }
 0x115   :  { %2877 = vst [vmem:[#allocation45_spill] sm:$0xff] %v1666_v3  ;;  %v717_v47 = vmul.f32 %v1666_v3, %v1666_v3  ;;  %v796_v26 = vadd.f32 %v795_v5, %v714_v63  ;;  %v642_v51 = vadd.f32 %v641_v53, %v1666_v3 }
 0x116   :  { %v1676_v21 = vpop.f32.mrf.mxu0 }
 0x117   :  { %v718_v7 = vmul.f32 %v1676_v21, %v1676_v21  ;;  %v797_v13 = vadd.f32 %v796_v26, %v716_v14  ;;  %v588_v63 = vadd.f32 %v587_v35, %v1676_v21  ;;  %v852_v5 = vadd.f32 %v851_v16, %v717_v47  ;;  %v1744_v26 = vpop.f32.mrf.mxu1 }
 0x118   :  { %v1684_v11 = vpop.f32.mrf.mxu0  ;;  %2887 = vst [vmem:[#allocation55_spill] sm:$0xff] %v1744_v26 }
 0x119   :  { %2879 = vst [vmem:[#allocation47_spill] sm:$0xff] %v1684_v11  ;;  %v719_v45 = vmul.f32 %v1684_v11, %v1684_v11  ;;  %v798_v37 = vadd.f32 %v797_v13, %v718_v7  ;;  %v643_v61 = vadd.f32 %v642_v51, %v1684_v11 }
 0x11a   :  { %v1694_v19 = vpop.f32.mrf.mxu0 }
 0x11b   :  { %2880 = vst [vmem:[#allocation48_spill] sm:$0xff] %v1694_v19  ;;  %v720_v31 = vmul.f32 %v1694_v19, %v1694_v19  ;;  %v589_v12 = vadd.f32 %v588_v63, %v1694_v19  ;;  %v853_v35 = vadd.f32 %v852_v5, %v719_v45 }
 0x11c   :  { %v1702_v24 = vpop.f32.mrf.mxu0 }
 0x11d   :  { %2881 = vst [vmem:[#allocation49_spill] sm:$0xff] %v1702_v24  ;;  %v721_v55 = vmul.f32 %v1702_v24, %v1702_v24  ;;  %v799_v16 = vadd.f32 %v798_v37, %v720_v31  ;;  %v644_v3 = vadd.f32 %v643_v61, %v1702_v24  ;;  %v1762_v37 = vpop.f32.mrf.mxu1 }
 0x11e   :  { %v1712_v10 = vpop.f32.mrf.mxu0 }
 0x11f   :  { %2883 = vst [vmem:[#allocation51_spill] sm:$0xff] %v1712_v10  ;;  %v722_v14 = vmul.f32 %v1712_v10, %v1712_v10  ;;  %v590_v7 = vadd.f32 %v589_v12, %v1712_v10  ;;  %v854_v13 = vadd.f32 %v853_v35, %v721_v55  ;;  %v1778_v10 = vpop.f32.mrf.mxu1 }
 0x120   :  { %v1720_v43 = vpop.f32.mrf.mxu0  ;;  %2890 = vst [vmem:[#allocation58_spill] sm:$0xff] %v1778_v10 }
 0x121   :  { %2884 = vst [vmem:[#allocation52_spill] sm:$0xff] %v1720_v43  ;;  %v723_v53 = vmul.f32 %v1720_v43, %v1720_v43  ;;  %v800_v45 = vadd.f32 %v799_v16, %v722_v14  ;;  %v645_v5 = vadd.f32 %v644_v3, %v1720_v43 }
 0x122   :  { %v1730_v39 = vpop.f32.mrf.mxu0 }
 0x123   :  { %2885 = vst [vmem:[#allocation53_spill] sm:$0xff] %v1730_v39  ;;  %v724_v51 = vmul.f32 %v1730_v39, %v1730_v39  ;;  %v591_v19 = vadd.f32 %v590_v7, %v1730_v39  ;;  %v855_v12 = vadd.f32 %v854_v13, %v723_v53 }
 0x124   :  { %v1738_v59 = vpop.f32.mrf.mxu0 }
 0x125   :  { %2886 = vst [vmem:[#allocation54_spill] sm:$0xff] %v1738_v59  ;;  %v725_v63 = vmul.f32 %v1738_v59, %v1738_v59  ;;  %v801_v35 = vadd.f32 %v800_v45, %v724_v51  ;;  %v646_v24 = vadd.f32 %v645_v5, %v1738_v59 }
 0x126   :  { %v1748_v47 = vpop.f32.mrf.mxu0 }
 0x127   :  { %v726_v31 = vmul.f32 %v1748_v47, %v1748_v47  ;;  %v592_v14 = vadd.f32 %v591_v19, %v1748_v47  ;;  %v856_v16 = vadd.f32 %v855_v12, %v725_v63 }
 0x128   :  { %v1756_v11 = vpop.f32.mrf.mxu0 }
 0x129   :  { %2888 = vst [vmem:[#allocation56_spill] sm:$0xff] %v1756_v11  ;;  %v727_v61 = vmul.f32 %v1756_v11, %v1756_v11  ;;  %v802_v43 = vadd.f32 %v801_v35, %v726_v31  ;;  %v647_v39 = vadd.f32 %v646_v24, %v1756_v11  ;;  %v732_v24 = vmul.f32 %v1463_v32, %v1463_v32 }
 0x12a   :  { %v1766_v55 = vpop.f32.mrf.mxu0 }
 0x12b   :  { %v728_v3 = vmul.f32 %v1766_v55, %v1766_v55  ;;  %v593_v53 = vadd.f32 %v592_v14, %v1766_v55  ;;  %v857_v51 = vadd.f32 %v856_v16, %v727_v61  ;;  %v734_v16 = vmul.f32 %v1471_v36, %v1471_v36 }
 0x12c   :  { %v1772_v7 = vpop.f32.mrf.mxu0 }
 0x12d   :  { %2889 = vst [vmem:[#allocation57_spill] sm:$0xff] %v1772_v7  ;;  %v729_v13 = vmul.f32 %v1772_v7, %v1772_v7  ;;  %v803_v19 = vadd.f32 %v802_v43, %v728_v3  ;;  %v648_v5 = vadd.f32 %v647_v39, %v1772_v7  ;;  %v1794_v39 = vpop.f32.mrf.mxu1  ;;  %v733_v3 = vmul.f32 %v1467_v34, %v1467_v34 }
 0x12e   :  { %v1780_v45 = vpop.f32.mrf.mxu0 }
 0x12f   :  { %v594_v63 = vadd.f32 %v593_v53, %v1780_v45  ;;  %v730_v31 = vmul.f32 %v1780_v45, %v1780_v45  ;;  %v858_v12 = vadd.f32 %v857_v51, %v729_v13 }
 0x130   :  { %v1788_v35 = vpop.f32.mrf.mxu0 }
 0x131   :  { %2891 = vst [vmem:[#allocation59_spill] sm:$0xff] %v1788_v35  ;;  %v595_v14 = vadd.f32 %v594_v63, %v1463_v32  ;;  %v804_v11 = vadd.f32 %v803_v19, %v730_v31  ;;  %v649_v61 = vadd.f32 %v648_v5, %v1788_v35  ;;  %v731_v43 = vmul.f32 %v1788_v35, %v1788_v35  ;;  %v1808_v32 = vpop.f32.mrf.mxu1 }
 0x132   :  { %v735_v19 = vmul.f32 %v1475_v38, %v1475_v38  ;;  %v736_v5 = vmul.f32 %v1479_v40, %v1479_v40  ;;  %2892 = vst [vmem:[#allocation60_spill] sm:$0xff] %v1808_v32 }
 0x133   :  { %v596_v53 = vadd.f32 %v595_v14, %v1471_v36  ;;  %v805_v13 = vadd.f32 %v804_v11, %v732_v24  ;;  %v650_v51 = vadd.f32 %v649_v61, %v1467_v34  ;;  %v859_v63 = vadd.f32 %v858_v12, %v731_v43 }
 0x134   :  { %v737_v11 = vmul.f32 %v1483_v42, %v1483_v42  ;;  %v738_v24 = vmul.f32 %v1487_v44, %v1487_v44 }
 0x135   :  { %v597_v31 = vadd.f32 %v596_v53, %v1479_v40  ;;  %v806_v35 = vadd.f32 %v805_v13, %v734_v16  ;;  %v651_v7 = vadd.f32 %v650_v51, %v1475_v38  ;;  %v860_v59 = vadd.f32 %v859_v63, %v733_v3  ;;  %v1822_v38 = vpop.f32.mrf.mxu1 }
 0x136   :  { %v739_v16 = vmul.f32 %v1491_v46, %v1491_v46  ;;  %v740_v3 = vmul.f32 %v1495_v48, %v1495_v48 }
 0x137   :  { %v598_v12 = vadd.f32 %v597_v31, %v1487_v44  ;;  %v807_v14 = vadd.f32 %v806_v35, %v736_v5  ;;  %v652_v61 = vadd.f32 %v651_v7, %v1483_v42  ;;  %v861_v43 = vadd.f32 %v860_v59, %v735_v19 }
 0x138   :  { %v741_v35 = vmul.f32 %v1499_v50, %v1499_v50  ;;  %v742_v59 = vmul.f32 %v1503_v52, %v1503_v52 }
 0x139   :  { %v599_v53 = vadd.f32 %v598_v12, %v1495_v48  ;;  %v808_v13 = vadd.f32 %v807_v14, %v738_v24  ;;  %v653_v51 = vadd.f32 %v652_v61, %v1491_v46  ;;  %v862_v63 = vadd.f32 %v861_v43, %v737_v11  ;;  %v1836_v46 = vpop.f32.mrf.mxu1 }
 0x13a   :  { %v743_v24 = vmul.f32 %v1507_v54, %v1507_v54  ;;  %v744_v11 = vmul.f32 %v1511_v56, %v1511_v56  ;;  %2893 = vst [vmem:[#allocation61_spill] sm:$0xff] %v1836_v46 }
 0x13b   :  { %v600_v7 = vadd.f32 %v599_v53, %v1503_v52  ;;  %v809_v19 = vadd.f32 %v808_v13, %v740_v3  ;;  %v654_v5 = vadd.f32 %v653_v51, %v1499_v50  ;;  %v863_v31 = vadd.f32 %v862_v63, %v739_v16  ;;  %v2897_v50 = vld [vmem:[#allocation34_spill] sm:$0xff] }
 0x13c   :  { %v745_v3 = vmul.f32 %v1515_v58, %v1515_v58  ;;  %v746_v16 = vmul.f32 %v1519_v60, %v1519_v60 }
 0x13d   :  { %v810_v12 = vadd.f32 %v809_v19, %v742_v59  ;;  %v655_v14 = vadd.f32 %v654_v5, %v1507_v54  ;;  %v864_v61 = vadd.f32 %v863_v31, %v741_v35  ;;  %v601_v43 = vadd.f32 %v600_v7, %v1511_v56  ;;  %v1850_v54 = vpop.f32.mrf.mxu1 }
 0x13e   :  { %v747_v59 = vmul.f32 %v1523_v62, %v1523_v62  ;;  %v748_v35 = vmul.f32 %v1527_v0, %v1527_v0 }
 0x13f   :  { %v656_v53 = vadd.f32 %v655_v14, %v1515_v58  ;;  %v865_v13 = vadd.f32 %v864_v61, %v743_v24  ;;  %v602_v51 = vadd.f32 %v601_v43, %v1519_v60  ;;  %v811_v63 = vadd.f32 %v810_v12, %v744_v11  ;;  %v2895_v58 = vld [vmem:[#allocation29_spill] sm:$0xff] }
 0x140   :  { %v749_v24 = vmul.f32 %v1531_v2, %v1531_v2  ;;  %v750_v11 = vmul.f32 %v1535_v4, %v1535_v4 }
 0x141   :  { %v866_v7 = vadd.f32 %v865_v13, %v745_v3  ;;  %v603_v19 = vadd.f32 %v602_v51, %v1527_v0  ;;  %v812_v5 = vadd.f32 %v811_v63, %v746_v16  ;;  %v657_v31 = vadd.f32 %v656_v53, %v1523_v62  ;;  %v1864_v62 = vpop.f32.mrf.mxu1 }
 0x142   :  { %v751_v3 = vmul.f32 %v1539_v6, %v1539_v6  ;;  %v752_v16 = vmul.f32 %v1543_v8, %v1543_v8  ;;  %2894 = vst [vmem:[#allocation62_spill] sm:$0xff] %v1864_v62 }
 0x143   :  { %v604_v12 = vadd.f32 %v603_v19, %v1535_v4  ;;  %v813_v14 = vadd.f32 %v812_v5, %v748_v35  ;;  %v658_v61 = vadd.f32 %v657_v31, %v1531_v2  ;;  %v867_v43 = vadd.f32 %v866_v7, %v747_v59  ;;  %v2896_v19 = vld [vmem:[#allocation31_spill] sm:$0xff] }
 0x144   :  { %v753_v35 = vmul.f32 %v2895_v58, %v2895_v58  ;;  %v754_v59 = vmul.f32 %v2896_v19, %v2896_v19 }
 0x145   :  { %v605_v53 = vadd.f32 %v604_v12, %v1543_v8  ;;  %v814_v13 = vadd.f32 %v813_v14, %v750_v11  ;;  %v659_v51 = vadd.f32 %v658_v61, %v1539_v6  ;;  %v868_v63 = vadd.f32 %v867_v43, %v749_v24  ;;  %v1878_v6 = vpop.f32.mrf.mxu1 }
 0x146   :  { %v755_v11 = vmul.f32 %v2897_v50, %v2897_v50  ;;  %v756_v24 = vmul.f32 %v1582_v29, %v1582_v29 }
 0x147   :  { %v606_v7 = vadd.f32 %v605_v53, %v2896_v19  ;;  %v815_v5 = vadd.f32 %v814_v13, %v752_v16  ;;  %v660_v31 = vadd.f32 %v659_v51, %v2895_v58  ;;  %v869_v2 = vadd.f32 %v868_v63, %v751_v3 }
 0x148   :  { %v757_v16 = vmul.f32 %v1600_v25, %v1600_v25  ;;  %v758_v3 = vmul.f32 %v1618_v17, %v1618_v17 }
 0x149   :  { %v607_v12 = vadd.f32 %v606_v7, %v1582_v29  ;;  %v816_v14 = vadd.f32 %v815_v5, %v754_v59  ;;  %v661_v61 = vadd.f32 %v660_v31, %v2897_v50  ;;  %v870_v43 = vadd.f32 %v869_v2, %v753_v35  ;;  %v1892_v50 = vpop.f32.mrf.mxu1 }
 0x14a   :  { %v759_v59 = vmul.f32 %v1636_v30, %v1636_v30  ;;  %v760_v2 = vmul.f32 %v1654_v27, %v1654_v27  ;;  %2898 = vst [vmem:[#allocation31_spill] sm:$0xff] %v1892_v50 }
 0x14b   :  { %v608_v53 = vadd.f32 %v607_v12, %v1618_v17  ;;  %v817_v13 = vadd.f32 %v816_v14, %v756_v24  ;;  %v662_v51 = vadd.f32 %v661_v61, %v1600_v25  ;;  %v871_v63 = vadd.f32 %v870_v43, %v755_v11 }
 0x14c   :  { %v761_v24 = vmul.f32 %v1672_v22, %v1672_v22  ;;  %v762_v11 = vmul.f32 %v1690_v20, %v1690_v20 }
 0x14d   :  { %v818_v35 = vadd.f32 %v817_v13, %v758_v3  ;;  %v663_v7 = vadd.f32 %v662_v51, %v1636_v30  ;;  %v872_v5 = vadd.f32 %v871_v63, %v757_v16  ;;  %v609_v31 = vadd.f32 %v608_v53, %v1654_v27  ;;  %v1906_v30 = vpop.f32.mrf.mxu1 }
 0x14e   :  { %v763_v3 = vmul.f32 %v1708_v28, %v1708_v28  ;;  %v764_v16 = vmul.f32 %v1726_v23, %v1726_v23 }
 0x14f   :  { %v873_v12 = vadd.f32 %v872_v5, %v759_v59  ;;  %v819_v14 = vadd.f32 %v818_v35, %v760_v2  ;;  %v664_v61 = vadd.f32 %v663_v7, %v1672_v22  ;;  %v610_v43 = vadd.f32 %v609_v31, %v1690_v20 }
 0x150   :  { %v765_v59 = vmul.f32 %v1744_v26, %v1744_v26  ;;  %v766_v2 = vmul.f32 %v1762_v37, %v1762_v37 }
 0x151   :  { %v874_v53 = vadd.f32 %v873_v12, %v761_v24  ;;  %v820_v13 = vadd.f32 %v819_v14, %v762_v11  ;;  %v665_v51 = vadd.f32 %v664_v61, %v1708_v28  ;;  %v611_v63 = vadd.f32 %v610_v43, %v1726_v23  ;;  %v1920_v28 = vpop.f32.mrf.mxu1 }
 0x152   :  { %v767_v24 = vmul.f32 %v1778_v10, %v1778_v10  ;;  %v768_v11 = vmul.f32 %v1794_v39, %v1794_v39  ;;  %2899 = vst [vmem:[#allocation63_spill] sm:$0xff] %v1920_v28 }
 0x153   :  { %v875_v35 = vadd.f32 %v874_v53, %v763_v3  ;;  %v821_v7 = vadd.f32 %v820_v13, %v764_v16  ;;  %v666_v5 = vadd.f32 %v665_v51, %v1744_v26  ;;  %v612_v31 = vadd.f32 %v611_v63, %v1762_v37 }
 0x154   :  { %v769_v3 = vmul.f32 %v1808_v32, %v1808_v32  ;;  %v770_v16 = vmul.f32 %v1822_v38, %v1822_v38 }
 0x155   :  { %v876_v12 = vadd.f32 %v875_v35, %v765_v59  ;;  %v822_v14 = vadd.f32 %v821_v7, %v766_v2  ;;  %v667_v61 = vadd.f32 %v666_v5, %v1778_v10  ;;  %v613_v43 = vadd.f32 %v612_v31, %v1794_v39  ;;  %v1934_v10 = vpop.f32.mrf.mxu1 }
 0x156   :  { %v771_v59 = vmul.f32 %v1836_v46, %v1836_v46  ;;  %v772_v2 = vmul.f32 %v1850_v54, %v1850_v54 }
 0x157   :  { %v877_v53 = vadd.f32 %v876_v12, %v767_v24  ;;  %v823_v13 = vadd.f32 %v822_v14, %v768_v11  ;;  %v668_v51 = vadd.f32 %v667_v61, %v1808_v32  ;;  %v614_v63 = vadd.f32 %v613_v43, %v1822_v38 }
 0x158   :  { %v773_v24 = vmul.f32 %v1864_v62, %v1864_v62  ;;  %v774_v11 = vmul.f32 %v1878_v6, %v1878_v6 }
 0x159   :  { %v878_v35 = vadd.f32 %v877_v53, %v769_v3  ;;  %v824_v7 = vadd.f32 %v823_v13, %v770_v16  ;;  %v669_v5 = vadd.f32 %v668_v51, %v1836_v46  ;;  %v615_v31 = vadd.f32 %v614_v63, %v1850_v54  ;;  %v1948_v46 = vpop.f32.mrf.mxu1 }
 0x15a   :  { %v775_v3 = vmul.f32 %v1892_v50, %v1892_v50  ;;  %v776_v16 = vmul.f32 %v1906_v30, %v1906_v30  ;;  %2900 = vst [vmem:[#allocation64_spill] sm:$0xff] %v1948_v46 }
 0x15b   :  { %v879_v12 = vadd.f32 %v878_v35, %v771_v59  ;;  %v825_v14 = vadd.f32 %v824_v7, %v772_v2  ;;  %v670_v61 = vadd.f32 %v669_v5, %v1864_v62  ;;  %v616_v43 = vadd.f32 %v615_v31, %v1878_v6 }
 0x15c   :  { %v777_v59 = vmul.f32 %v1920_v28, %v1920_v28  ;;  %v778_v2 = vmul.f32 %v1934_v10, %v1934_v10 }
 0x15d   :  { %v880_v53 = vadd.f32 %v879_v12, %v773_v24  ;;  %v826_v13 = vadd.f32 %v825_v14, %v774_v11  ;;  %v671_v51 = vadd.f32 %v670_v61, %v1892_v50  ;;  %v617_v63 = vadd.f32 %v616_v43, %v1906_v30 }
 0x15e   :  { %v779_v24 = vmul.f32 %v1948_v46, %v1948_v46 }
 0x15f   :  { %v881_v35 = vadd.f32 %v880_v53, %v775_v3  ;;  %v827_v7 = vadd.f32 %v826_v13, %v776_v16  ;;  %v672_v5 = vadd.f32 %v671_v51, %v1920_v28  ;;  %v618_v31 = vadd.f32 %v617_v63, %v1934_v10 }
 0x161   :  { %v882_v11 = vadd.f32 %v881_v35, %v777_v59  ;;  %v619_v12 = vrot.slane %v618_v31, 4  ;;  %v828_v14 = vadd.f32 %v827_v7, %v778_v2  ;;  %v673_v61 = vadd.f32 %v672_v5, %v1948_v46 }
 0x163   :  { %v620_v43 = vadd.f32 %v619_v12, %v618_v31  ;;  %v829_v50 = vrot.slane %v828_v14, 4  ;;  %v674_v62 = vrot.slane %v673_v61, 4  ;;  %v883_v32 = vadd.f32 %v882_v11, %v779_v24 }
 0x165   :  { %v621_v26 = vrot.slane %v620_v43, 2  ;;  %v830_v22 = vadd.f32 %v829_v50, %v828_v14  ;;  %v675_v3 = vadd.f32 %v674_v62, %v673_v61  ;;  %v884_v16 = vrot.slane %v883_v32, 4 }
 0x167   :  { %v622_v53 = vadd.f32 %v621_v26, %v620_v43  ;;  %v831_v13 = vrot.slane %v830_v22, 2  ;;  %v676_v51 = vrot.slane %v675_v3, 2  ;;  %v885_v63 = vadd.f32 %v884_v16, %v883_v32 }
 0x169   :  { %v623_v28 = vrot.slane %v622_v53, 1  ;;  %v832_v25 = vadd.f32 %v831_v13, %v830_v22  ;;  %v677_v58 = vadd.f32 %v676_v51, %v675_v3  ;;  %v886_v59 = vrot.slane %v885_v63, 2  ;;  %v2901_v13 = vld [vmem:[#allocation2_spill] sm:$0xff] }
 0x16b   :  { %v624_v35 = vadd.f32 %v623_v28, %v622_v53  ;;  %v833_v2 = vrot.slane %v832_v25, 1  ;;  %v678_v7 = vrot.slane %v677_v58, 1  ;;  %v887_v5 = vadd.f32 %v886_v59, %v885_v63  ;;  %v2902_v63 = vld [vmem:[#allocation5_spill] sm:$0xff]  ;;  %v2903_v59 = vld [vmem:[#allocation7_spill] sm:$0xff] }
 0x16d   :  { %v834_v31 = vadd.f32 %v833_v2, %v832_v25  ;;  %v890_v12 = vmul.f32 0.0025510204, %v624_v35  ;;  %v679_v46 = vadd.f32 %v678_v7, %v677_v58  ;;  %v888_v24 = vrot.slane %v887_v5, 1  ;;  %v2904_v7 = vld [vmem:[#allocation11_spill] sm:$0xff] }
 0x16f   :  { %v892_v11 = vmul.f32 0.0025510204, %v834_v31  ;;  %v894_v50 = vmul.f32 %v890_v12, %v890_v12  ;;  %v889_v14 = vadd.f32 %v888_v24, %v887_v5  ;;  %v1959_v26 = vmul.f32 0.0025510204, %v679_v46  ;;  %v2905_v24 = vld [vmem:[#allocation16_spill] sm:$0xff] }
 0x171   :  { %v896_v62 = vsub.f32 %v892_v11, %v894_v50  ;;  %v893_v43 = vmul.f32 0.0025510204, %v889_v14  ;;  %v895_v22 = vmul.f32 %v1959_v26, %v1959_v26  ;;  %v2906_v50 = vld [vmem:[#allocation21_spill] sm:$0xff] }
 0x173   :  { %v898_v61 = vmax.f32 %v896_v62, 0.0  ;;  %v897_v28 = vsub.f32 %v893_v43, %v895_v22 }
 0x175   :  { %v900_v32 = vadd.f32 1e-05, %v898_v61  ;;  %v899_v3 = vmax.f32 %v897_v28, 0.0 }
 0x177   :  { %1302 = vrsqrt.f32 %v900_v32  ;;  %v901_v16 = vadd.f32 1e-05, %v899_v3 }
 0x179   :  { %1304 = vrsqrt.f32 %v901_v16 }
 0x184   :  { %v1303_v25 = vpop.eup %1302 }
 0x185   :  { %v904_v53 = vmul.f32 2.0, %v1303_v25 }
 0x187   :  { %v1963_v58 = vmul.f32 %v904_v53, %v890_v12  ;;  %v908_v51 = vmul.f32 %v904_v53, %v2901_v13  ;;  %v1967_v46 = vmul.f32 %v904_v53, %v2902_v63  ;;  %v1970_v35 = vmul.f32 %v904_v53, %v2903_v59 }
 0x188   :  { %v1973_v2 = vmul.f32 %v904_v53, %v1481_v41  ;;  %v1976_v5 = vmul.f32 %v904_v53, %v2904_v7  ;;  %v1979_v31 = vmul.f32 %v904_v53, %v1497_v49  ;;  %v1982_v12 = vmul.f32 %v904_v53, %v2905_v24  ;;  %v2907_v41 = vld [vmem:[#allocation26_spill] sm:$0xff]  ;;  %v2908_v49 = vld [vmem:[#allocation32_spill] sm:$0xff]  ;;  %v2913_v7 = vld [vmem:[#allocation51_spill] sm:$0xff] }
 0x189   :  { %v1985_v11 = vmul.f32 %v904_v53, %v1513_v57  ;;  %v1988_v62 = vmul.f32 %v904_v53, %v2906_v50  ;;  %v1991_v14 = vmul.f32 %v904_v53, %v1529_v1  ;;  %v1994_v61 = vmul.f32 %v904_v53, %v2907_v41  ;;  %v2909_v57 = vld [vmem:[#allocation36_spill] sm:$0xff] }
 0x18a   :  { %v1997_v32 = vmul.f32 %v904_v53, %v1545_v9  ;;  %v2000_v43 = vmul.f32 %v904_v53, %v2908_v49  ;;  %v2003_v22 = vmul.f32 %v904_v53, %v1563_v18  ;;  %v2006_v28 = vmul.f32 %v904_v53, %v2909_v57  ;;  %v2910_v1 = vld [vmem:[#allocation40_spill] sm:$0xff] }
 0x18b   :  { %v2009_v3 = vmul.f32 %v904_v53, %v1604_v33  ;;  %v2012_v16 = vmul.f32 %v904_v53, %v2910_v1  ;;  %v2015_v25 = vmul.f32 %v904_v53, %v1640_v15  ;;  %v2911_v9 = vld [vmem:[#allocation44_spill] sm:$0xff]  ;;  %v2021_v63 = vmul.f32 %v904_v53, %v1676_v21  ;;  %v2914_v33 = vld [vmem:[#allocation53_spill] sm:$0xff] }
 0x18c   :  { %v2018_v13 = vmul.f32 %v904_v53, %v2911_v9  ;;  %v2912_v18 = vld [vmem:[#allocation48_spill] sm:$0xff]  ;;  %v2027_v24 = vmul.f32 %v904_v53, %v2913_v7  ;;  %v2030_v50 = vmul.f32 %v904_v53, %v2914_v33  ;;  %v2033_v41 = vmul.f32 %v904_v53, %v1748_v47 }
 0x18d   :  { %v2024_v59 = vmul.f32 %v904_v53, %v2912_v18  ;;  %v2036_v15 = vmul.f32 %v904_v53, %v1766_v55  ;;  %v2039_v49 = vmul.f32 %v904_v53, %v1780_v45  ;;  %v2915_v21 = vld [vmem:[#allocation4_spill] sm:$0xff]  ;;  %v2045_v1 = vmul.f32 %v904_v53, %v1471_v36 }
 0x18e   :  { %v2042_v57 = vmul.f32 %v904_v53, %v2915_v21  ;;  %v2048_v9 = vmul.f32 %v904_v53, %v1479_v40  ;;  %v2051_v18 = vmul.f32 %v904_v53, %v1487_v44  ;;  %v2054_v47 = vmul.f32 %v904_v53, %v1495_v48 }
 0x18f   :  { %v2057_v55 = vmul.f32 %v904_v53, %v1503_v52  ;;  %v2060_v45 = vmul.f32 %v904_v53, %v1511_v56  ;;  %v2063_v7 = vmul.f32 %v904_v53, %v1519_v60  ;;  %v2066_v36 = vmul.f32 %v904_v53, %v1527_v0 }
 0x190   :  { %v2069_v40 = vmul.f32 %v904_v53, %v1535_v4  ;;  %v2072_v44 = vmul.f32 %v904_v53, %v1543_v8  ;;  %v2075_v48 = vmul.f32 %v904_v53, %v2896_v19  ;;  %v2078_v52 = vmul.f32 %v904_v53, %v1582_v29 }
 0x191   :  { %v2081_v56 = vmul.f32 %v904_v53, %v1618_v17  ;;  %v2084_v60 = vmul.f32 %v904_v53, %v1654_v27  ;;  %v2087_v0 = vmul.f32 %v904_v53, %v1690_v20  ;;  %v2090_v4 = vmul.f32 %v904_v53, %v1726_v23  ;;  %v2104_v27 = vpop.eup %1304 }
 0x192   :  { %v2093_v8 = vmul.f32 %v904_v53, %v1762_v37  ;;  %v2096_v19 = vmul.f32 %v904_v53, %v1794_v39  ;;  %v2099_v29 = vmul.f32 %v904_v53, %v1822_v38  ;;  %v2102_v17 = vmul.f32 %v904_v53, %v1850_v54 }
 0x193   :  { %v2107_v20 = vmul.f32 %v904_v53, %v1878_v6  ;;  %v2110_v23 = vmul.f32 %v904_v53, %v1906_v30  ;;  %v2113_v37 = vmul.f32 %v904_v53, %v1934_v10  ;;  %v1008_v39 = vsub.f32 %v908_v51, %v1963_v58 }
 0x194   :  { %v1010_v38 = vsub.f32 %v1967_v46, %v1963_v58  ;;  %v1012_v54 = vsub.f32 %v1970_v35, %v1963_v58  ;;  %v1014_v33 = vsub.f32 %v1973_v2, %v1963_v58  ;;  %v1016_v6 = vsub.f32 %v1976_v5, %v1963_v58 }
 0x195   :  { %v1018_v30 = vsub.f32 %v1979_v31, %v1963_v58  ;;  %v1020_v10 = vsub.f32 %v1982_v12, %v1963_v58  ;;  %v1022_v53 = vsub.f32 %v1985_v11, %v1963_v58  ;;  %v1024_v51 = vsub.f32 %v1988_v62, %v1963_v58  ;;  %1108 = vst [vmem:[%s2767_s2] sm:$0xff] %v1008_v39 }
 0x196   :  { %v1026_v46 = vsub.f32 %v1991_v14, %v1963_v58  ;;  %v1028_v35 = vsub.f32 %v1994_v61, %v1963_v58  ;;  %v1030_v2 = vsub.f32 %v1997_v32, %v1963_v58  ;;  %v1032_v5 = vsub.f32 %v2000_v43, %v1963_v58  ;;  %1110 = vst [vmem:[%s2767_s2 + $0x10] sm:$0xff] %v1010_v38  ;;  %v2921_v38 = vld [vmem:[#allocation15_spill] sm:$0xff] }
 0x197   :  { %1112 = vst [vmem:[%s2767_s2 + $0x20] sm:$0xff] %v1012_v54  ;;  %1114 = vst [vmem:[%s2767_s2 + $0x30] sm:$0xff] %v1014_v33  ;;  %v1034_v31 = vsub.f32 %v2003_v22, %v1963_v58  ;;  %v1036_v12 = vsub.f32 %v2006_v28, %v1963_v58  ;;  %v1038_v11 = vsub.f32 %v2009_v3, %v1963_v58  ;;  %v2922_v33 = vld [vmem:[#allocation18_spill] sm:$0xff] }
 0x198   :  { %1116 = vst [vmem:[%s2767_s2 + $0x40] sm:$0xff] %v1016_v6  ;;  %v1040_v62 = vsub.f32 %v2012_v16, %v1963_v58  ;;  %1118 = vst [vmem:[%s2767_s2 + $0x50] sm:$0xff] %v1018_v30  ;;  %v1042_v14 = vsub.f32 %v2015_v25, %v1963_v58  ;;  %v1044_v61 = vsub.f32 %v2018_v13, %v1963_v58  ;;  %v2923_v6 = vld [vmem:[#allocation20_spill] sm:$0xff] }
 0x199   :  { %1120 = vst [vmem:[%s2767_s2 + $0x60] sm:$0xff] %v1020_v10  ;;  %1122 = vst [vmem:[%s2767_s2 + $0x70] sm:$0xff] %v1022_v53  ;;  %v1046_v32 = vsub.f32 %v2021_v63, %v1963_v58  ;;  %v1048_v43 = vsub.f32 %v2024_v59, %v1963_v58  ;;  %v1050_v22 = vsub.f32 %v2027_v24, %v1963_v58  ;;  %v2924_v10 = vld [vmem:[#allocation23_spill] sm:$0xff] }
 0x19a   :  { %1124 = vst [vmem:[%s2767_s2 + $0x80] sm:$0xff] %v1024_v51  ;;  %1126 = vst [vmem:[%s2767_s2 + $0x90] sm:$0xff] %v1026_v46  ;;  %v1052_v28 = vsub.f32 %v2030_v50, %v1963_v58  ;;  %v1054_v3 = vsub.f32 %v2033_v41, %v1963_v58  ;;  %v1056_v16 = vsub.f32 %v2036_v15, %v1963_v58  ;;  %v2925_v51 = vld [vmem:[#allocation25_spill] sm:$0xff] }
 0x19b   :  { %1128 = vst [vmem:[%s2767_s2 + $0xa0] sm:$0xff] %v1028_v35  ;;  %1130 = vst [vmem:[%s2767_s2 + $0xb0] sm:$0xff] %v1030_v2  ;;  %v1058_v25 = vsub.f32 %v2039_v49, %v1963_v58  ;;  %v1060_v13 = vsub.f32 %v2042_v57, %v1963_v58  ;;  %v1062_v63 = vsub.f32 %v2045_v1, %v1963_v58  ;;  %v2926_v35 = vld [vmem:[#allocation28_spill] sm:$0xff] }
 0x19c   :  { %1132 = vst [vmem:[%s2767_s2 + $0xc0] sm:$0xff] %v1032_v5  ;;  %1134 = vst [vmem:[%s2767_s2 + $0xd0] sm:$0xff] %v1034_v31  ;;  %v1064_v59 = vsub.f32 %v2048_v9, %v1963_v58  ;;  %v1066_v24 = vsub.f32 %v2051_v18, %v1963_v58  ;;  %v1068_v50 = vsub.f32 %v2054_v47, %v1963_v58  ;;  %v2927_v5 = vld [vmem:[#allocation30_spill] sm:$0xff] }
 0x19d   :  { %1136 = vst [vmem:[%s2767_s2 + $0xe0] sm:$0xff] %v1036_v12  ;;  %1138 = vst [vmem:[%s2767_s2 + $0xf0] sm:$0xff] %v1038_v11  ;;  %v1070_v41 = vsub.f32 %v2057_v55, %v1963_v58  ;;  %v1072_v15 = vsub.f32 %v2060_v45, %v1963_v58  ;;  %v1074_v49 = vsub.f32 %v2063_v7, %v1963_v58  ;;  %v2928_v12 = vld [vmem:[#allocation33_spill] sm:$0xff] }
 0x19e   :  { %1140 = vst [vmem:[%s2767_s2 + $0x100] sm:$0xff] %v1040_v62  ;;  %1142 = vst [vmem:[%s2767_s2 + $0x110] sm:$0xff] %v1042_v14  ;;  %v1076_v21 = vsub.f32 %v2066_v36, %v1963_v58  ;;  %v1078_v57 = vsub.f32 %v2069_v40, %v1963_v58  ;;  %v1080_v1 = vsub.f32 %v2072_v44, %v1963_v58  ;;  %v2929_v62 = vld [vmem:[#allocation35_spill] sm:$0xff] }
 0x19f   :  { %1144 = vst [vmem:[%s2767_s2 + $0x120] sm:$0xff] %v1044_v61  ;;  %1146 = vst [vmem:[%s2767_s2 + $0x130] sm:$0xff] %v1046_v32  ;;  %v1082_v9 = vsub.f32 %v2075_v48, %v1963_v58  ;;  %v1084_v18 = vsub.f32 %v2078_v52, %v1963_v58  ;;  %v1086_v47 = vsub.f32 %v2081_v56, %v1963_v58  ;;  %v2930_v61 = vld [vmem:[#allocation37_spill] sm:$0xff] }
 0x1a0   :  { %1148 = vst [vmem:[%s2767_s2 + $0x140] sm:$0xff] %v1048_v43  ;;  %1150 = vst [vmem:[%s2767_s2 + $0x150] sm:$0xff] %v1050_v22  ;;  %v1088_v55 = vsub.f32 %v2084_v60, %v1963_v58  ;;  %v1090_v45 = vsub.f32 %v2087_v0, %v1963_v58  ;;  %v1092_v7 = vsub.f32 %v2090_v4, %v1963_v58  ;;  %v905_v0 = vmul.f32 2.0, %v2104_v27  ;;  %v2916_v4 = vld [vmem:[#allocation3_spill] sm:$0xff] }
 0x1a1   :  { %1152 = vst [vmem:[%s2767_s2 + $0x160] sm:$0xff] %v1052_v28  ;;  %1154 = vst [vmem:[%s2767_s2 + $0x170] sm:$0xff] %v1054_v3  ;;  %v1094_v36 = vsub.f32 %v2093_v8, %v1963_v58  ;;  %v1096_v40 = vsub.f32 %v2096_v19, %v1963_v58  ;;  %v1098_v44 = vsub.f32 %v2099_v29, %v1963_v58  ;;  %v2917_v19 = vld [vmem:[#allocation6_spill] sm:$0xff]  ;;  %v2931_v43 = vld [vmem:[#allocation39_spill] sm:$0xff] }
 0x1a2   :  { %1156 = vst [vmem:[%s2767_s2 + $0x180] sm:$0xff] %v1056_v16  ;;  %1158 = vst [vmem:[%s2767_s2 + $0x190] sm:$0xff] %v1058_v25  ;;  %v1100_v48 = vsub.f32 %v2102_v17, %v1963_v58  ;;  %v1102_v52 = vsub.f32 %v2107_v20, %v1963_v58  ;;  %v1104_v56 = vsub.f32 %v2110_v23, %v1963_v58  ;;  %v2918_v17 = vld [vmem:[#allocation9_spill] sm:$0xff]  ;;  %v2919_v20 = vld [vmem:[#allocation10_spill] sm:$0xff] }
 0x1a3   :  { %1160 = vst [vmem:[%s2767_s2 + $0x1a0] sm:$0xff] %v1060_v13  ;;  %1162 = vst [vmem:[%s2767_s2 + $0x1b0] sm:$0xff] %v1062_v63  ;;  %v1106_v60 = vsub.f32 %v2113_v37, %v1963_v58  ;;  %v2366_v58 = vmul.f32 %v905_v0, %v1959_v26  ;;  %v909_v8 = vmul.f32 %v905_v0, %v2916_v4  ;;  %v2920_v37 = vld [vmem:[#allocation13_spill] sm:$0xff]  ;;  %v2933_v16 = vld [vmem:[#allocation43_spill] sm:$0xff] }
 0x1a4   :  { %1164 = vst [vmem:[%s2767_s2 + $0x1c0] sm:$0xff] %v1064_v59  ;;  %1166 = vst [vmem:[%s2767_s2 + $0x1d0] sm:$0xff] %v1066_v24  ;;  %v2370_v29 = vmul.f32 %v905_v0, %v2917_v19  ;;  %v2373_v27 = vmul.f32 %v905_v0, %v2918_v17  ;;  %v2376_v23 = vmul.f32 %v905_v0, %v2919_v20  ;;  %v2932_v28 = vld [vmem:[#allocation41_spill] sm:$0xff]  ;;  %v2935_v59 = vld [vmem:[#allocation47_spill] sm:$0xff] }
 0x1a5   :  { %1168 = vst [vmem:[%s2767_s2 + $0x1e0] sm:$0xff] %v1068_v50  ;;  %1170 = vst [vmem:[%s2767_s2 + $0x1f0] sm:$0xff] %v1070_v41  ;;  %v2379_v39 = vmul.f32 %v905_v0, %v2920_v37  ;;  %v2382_v54 = vmul.f32 %v905_v0, %v2921_v38  ;;  %v2385_v26 = vmul.f32 %v905_v0, %v2922_v33  ;;  %v2934_v13 = vld [vmem:[#allocation45_spill] sm:$0xff]  ;;  %v2946_v17 = vld [vmem:[#allocation19_spill] sm:$0xff] }
 0x1a6   :  { %1172 = vst [vmem:[%s2767_s2 + $0x200] sm:$0xff] %v1072_v15  ;;  %1174 = vst [vmem:[%s2767_s2 + $0x210] sm:$0xff] %v1074_v49  ;;  %v2388_v30 = vmul.f32 %v905_v0, %v2923_v6  ;;  %v2391_v53 = vmul.f32 %v905_v0, %v2924_v10  ;;  %v2394_v46 = vmul.f32 %v905_v0, %v2925_v51  ;;  %v2936_v50 = vld [vmem:[#allocation49_spill] sm:$0xff]  ;;  %v2937_v15 = vld [vmem:[#allocation52_spill] sm:$0xff] }
 0x1a7   :  { %1176 = vst [vmem:[%s2767_s2 + $0x220] sm:$0xff] %v1076_v21  ;;  %1178 = vst [vmem:[%s2767_s2 + $0x230] sm:$0xff] %v1078_v57  ;;  %v2397_v2 = vmul.f32 %v905_v0, %v2926_v35  ;;  %v2400_v31 = vmul.f32 %v905_v0, %v2927_v5  ;;  %v2403_v11 = vmul.f32 %v905_v0, %v2928_v12  ;;  %v2938_v21 = vld [vmem:[#allocation54_spill] sm:$0xff]  ;;  %v2945_v4 = vld [vmem:[#allocation17_spill] sm:$0xff] }
 0x1a8   :  { %1180 = vst [vmem:[%s2767_s2 + $0x240] sm:$0xff] %v1080_v1  ;;  %1182 = vst [vmem:[%s2767_s2 + $0x250] sm:$0xff] %v1082_v9  ;;  %v2406_v14 = vmul.f32 %v905_v0, %v2929_v62  ;;  %v2409_v32 = vmul.f32 %v905_v0, %v2930_v61  ;;  %v2412_v22 = vmul.f32 %v905_v0, %v2931_v43  ;;  %v2939_v1 = vld [vmem:[#allocation56_spill] sm:$0xff]  ;;  %v2950_v10 = vld [vmem:[#allocation29_spill] sm:$0xff] }
 0x1a9   :  { %1184 = vst [vmem:[%s2767_s2 + $0x260] sm:$0xff] %v1084_v18  ;;  %1186 = vst [vmem:[%s2767_s2 + $0x270] sm:$0xff] %v1086_v47  ;;  %v2415_v3 = vmul.f32 %v905_v0, %v2932_v28  ;;  %v2418_v25 = vmul.f32 %v905_v0, %v2933_v16  ;;  %v2421_v63 = vmul.f32 %v905_v0, %v2934_v13  ;;  %v2940_v18 = vld [vmem:[#allocation57_spill] sm:$0xff]  ;;  %v2948_v38 = vld [vmem:[#allocation24_spill] sm:$0xff] }
 0x1aa   :  { %1188 = vst [vmem:[%s2767_s2 + $0x280] sm:$0xff] %v1088_v55  ;;  %1190 = vst [vmem:[%s2767_s2 + $0x290] sm:$0xff] %v1090_v45  ;;  %v2424_v24 = vmul.f32 %v905_v0, %v2935_v59  ;;  %v2427_v41 = vmul.f32 %v905_v0, %v2936_v50  ;;  %v2430_v49 = vmul.f32 %v905_v0, %v2937_v15  ;;  %v2941_v55 = vld [vmem:[#allocation59_spill] sm:$0xff]  ;;  %v2951_v35 = vld [vmem:[#allocation34_spill] sm:$0xff] }
 0x1ab   :  { %1192 = vst [vmem:[%s2767_s2 + $0x2a0] sm:$0xff] %v1092_v7  ;;  %1194 = vst [vmem:[%s2767_s2 + $0x2b0] sm:$0xff] %v1094_v36  ;;  %v2433_v57 = vmul.f32 %v905_v0, %v2938_v21  ;;  %v2436_v9 = vmul.f32 %v905_v0, %v2939_v1  ;;  %v2439_v47 = vmul.f32 %v905_v0, %v2940_v18  ;;  %v2942_v36 = vld [vmem:[#allocation8_spill] sm:$0xff]  ;;  %v2952_v12 = vld [vmem:[#allocation38_spill] sm:$0xff] }
 0x1ac   :  { %1196 = vst [vmem:[%s2767_s2 + $0x2c0] sm:$0xff] %v1096_v40  ;;  %1198 = vst [vmem:[%s2767_s2 + $0x2d0] sm:$0xff] %v1098_v44  ;;  %v2442_v45 = vmul.f32 %v905_v0, %v2941_v55  ;;  %v2445_v7 = vmul.f32 %v905_v0, %v1467_v34  ;;  %v2448_v40 = vmul.f32 %v905_v0, %v2942_v36  ;;  %v2947_v34 = vld [vmem:[#allocation22_spill] sm:$0xff]  ;;  %v2956_v50 = vld [vmem:[#allocation55_spill] sm:$0xff] }
 0x1ad   :  { %1200 = vst [vmem:[%s2767_s2 + $0x2e0] sm:$0xff] %v1100_v48  ;;  %1202 = vst [vmem:[%s2767_s2 + $0x2f0] sm:$0xff] %v1102_v52  ;;  %v2451_v44 = vmul.f32 %v905_v0, %v1483_v42  ;;  %v2943_v48 = vld [vmem:[#allocation12_spill] sm:$0xff]  ;;  %v2460_v19 = vmul.f32 %v905_v0, %v2945_v4  ;;  %v2463_v20 = vmul.f32 %v905_v0, %v2946_v17  ;;  %v2949_v42 = vld [vmem:[#allocation27_spill] sm:$0xff] }
 0x1ae   :  { %1204 = vst [vmem:[%s2767_s2 + $0x300] sm:$0xff] %v1104_v56  ;;  %1206 = vst [vmem:[%s2767_s2 + $0x310] sm:$0xff] %v1106_v60  ;;  %v2454_v52 = vmul.f32 %v905_v0, %v2943_v48  ;;  %v2944_v56 = vld [vmem:[#allocation14_spill] sm:$0xff]  ;;  %v2466_v37 = vmul.f32 %v905_v0, %v2947_v34  ;;  %v2469_v33 = vmul.f32 %v905_v0, %v2948_v38  ;;  %v2958_v18 = vld [vmem:[#allocation60_spill] sm:$0xff] }
 0x1af   :  { %v2457_v60 = vmul.f32 %v905_v0, %v2944_v56  ;;  %v2472_v6 = vmul.f32 %v905_v0, %v2949_v42  ;;  %v2475_v51 = vmul.f32 %v905_v0, %v2950_v10  ;;  %v2478_v5 = vmul.f32 %v905_v0, %v2951_v35  ;;  %v2953_v61 = vld [vmem:[#allocation42_spill] sm:$0xff]  ;;  %v2959_v36 = vld [vmem:[#allocation61_spill] sm:$0xff]  ;;  %v2961_v17 = vld [vmem:[#allocation31_spill] sm:$0xff] }
 0x1b0   :  { %v2481_v62 = vmul.f32 %v905_v0, %v2952_v12  ;;  %v2484_v43 = vmul.f32 %v905_v0, %v2953_v61  ;;  %v2954_v28 = vld [vmem:[#allocation46_spill] sm:$0xff]  ;;  %v2493_v15 = vmul.f32 %v905_v0, %v2956_v50  ;;  %v2499_v55 = vmul.f32 %v905_v0, %v2958_v18  ;;  %v2962_v38 = vld [vmem:[#allocation63_spill] sm:$0xff]  ;;  %v2963_v10 = vld [vmem:[#allocation64_spill] sm:$0xff] }
 0x1b1   :  { %v2487_v16 = vmul.f32 %v905_v0, %v2954_v28  ;;  %v2955_v13 = vld [vmem:[#allocation50_spill] sm:$0xff]  ;;  %v2502_v48 = vmul.f32 %v905_v0, %v2959_v36  ;;  %v2508_v34 = vmul.f32 %v905_v0, %v2961_v17  ;;  %v2511_v42 = vmul.f32 %v905_v0, %v2962_v38 }
 0x1b2   :  { %v2490_v59 = vmul.f32 %v905_v0, %v2955_v13  ;;  %v2957_v21 = vld [vmem:[#allocation58_spill] sm:$0xff]  ;;  %v2514_v35 = vmul.f32 %v905_v0, %v2963_v10  ;;  %v1009_v12 = vsub.f32 %v909_v8, %v2366_v58  ;;  %v1011_v61 = vsub.f32 %v2370_v29, %v2366_v58 }
 0x1b3   :  { %v2496_v1 = vmul.f32 %v905_v0, %v2957_v21  ;;  %v2960_v56 = vld [vmem:[#allocation62_spill] sm:$0xff]  ;;  %v1013_v28 = vsub.f32 %v2373_v27, %v2366_v58  ;;  %v1015_v13 = vsub.f32 %v2376_v23, %v2366_v58  ;;  %v1017_v50 = vsub.f32 %v2379_v39, %v2366_v58 }
 0x1b4   :  { %v2505_v4 = vmul.f32 %v905_v0, %v2960_v56  ;;  %v1019_v21 = vsub.f32 %v2382_v54, %v2366_v58  ;;  %v1021_v0 = vsub.f32 %v2385_v26, %v2366_v58  ;;  %v1023_v8 = vsub.f32 %v2388_v30, %v2366_v58  ;;  %1109 = vst [vmem:[%s2767_s2 + $0x8] sm:$0xff] %v1009_v12 }
 0x1b5   :  { %v1025_v29 = vsub.f32 %v2391_v53, %v2366_v58  ;;  %v1027_v27 = vsub.f32 %v2394_v46, %v2366_v58  ;;  %v1029_v23 = vsub.f32 %v2397_v2, %v2366_v58  ;;  %v1031_v39 = vsub.f32 %v2400_v31, %v2366_v58  ;;  %1111 = vst [vmem:[%s2767_s2 + $0x18] sm:$0xff] %v1011_v61 }
 0x1b6   :  { %v1033_v54 = vsub.f32 %v2403_v11, %v2366_v58  ;;  %1113 = vst [vmem:[%s2767_s2 + $0x28] sm:$0xff] %v1013_v28  ;;  %1115 = vst [vmem:[%s2767_s2 + $0x38] sm:$0xff] %v1015_v13  ;;  %v1035_v26 = vsub.f32 %v2406_v14, %v2366_v58  ;;  %v1037_v30 = vsub.f32 %v2409_v32, %v2366_v58 }
 0x1b7   :  { %1117 = vst [vmem:[%s2767_s2 + $0x48] sm:$0xff] %v1017_v50  ;;  %v1039_v53 = vsub.f32 %v2412_v22, %v2366_v58  ;;  %v1041_v46 = vsub.f32 %v2415_v3, %v2366_v58  ;;  %1119 = vst [vmem:[%s2767_s2 + $0x58] sm:$0xff] %v1019_v21  ;;  %v1043_v2 = vsub.f32 %v2418_v25, %v2366_v58 }
 0x1b8   :  { %1121 = vst [vmem:[%s2767_s2 + $0x68] sm:$0xff] %v1021_v0  ;;  %1123 = vst [vmem:[%s2767_s2 + $0x78] sm:$0xff] %v1023_v8  ;;  %v1045_v31 = vsub.f32 %v2421_v63, %v2366_v58  ;;  %v1047_v11 = vsub.f32 %v2424_v24, %v2366_v58  ;;  %v1049_v14 = vsub.f32 %v2427_v41, %v2366_v58 }
 0x1b9   :  { %1125 = vst [vmem:[%s2767_s2 + $0x88] sm:$0xff] %v1025_v29  ;;  %1127 = vst [vmem:[%s2767_s2 + $0x98] sm:$0xff] %v1027_v27  ;;  %v1051_v32 = vsub.f32 %v2430_v49, %v2366_v58  ;;  %v1053_v22 = vsub.f32 %v2433_v57, %v2366_v58  ;;  %v1055_v3 = vsub.f32 %v2436_v9, %v2366_v58 }
 0x1ba   :  { %1129 = vst [vmem:[%s2767_s2 + $0xa8] sm:$0xff] %v1029_v23  ;;  %1131 = vst [vmem:[%s2767_s2 + $0xb8] sm:$0xff] %v1031_v39  ;;  %v1057_v25 = vsub.f32 %v2439_v47, %v2366_v58  ;;  %v1059_v63 = vsub.f32 %v2442_v45, %v2366_v58  ;;  %v1061_v24 = vsub.f32 %v2445_v7, %v2366_v58 }
 0x1bb   :  { %1133 = vst [vmem:[%s2767_s2 + $0xc8] sm:$0xff] %v1033_v54  ;;  %1135 = vst [vmem:[%s2767_s2 + $0xd8] sm:$0xff] %v1035_v26  ;;  %v1063_v41 = vsub.f32 %v2448_v40, %v2366_v58  ;;  %v1065_v49 = vsub.f32 %v2451_v44, %v2366_v58  ;;  %v1067_v57 = vsub.f32 %v2454_v52, %v2366_v58 }
 0x1bc   :  { %1137 = vst [vmem:[%s2767_s2 + $0xe8] sm:$0xff] %v1037_v30  ;;  %1139 = vst [vmem:[%s2767_s2 + $0xf8] sm:$0xff] %v1039_v53  ;;  %v1069_v9 = vsub.f32 %v2457_v60, %v2366_v58  ;;  %v1071_v47 = vsub.f32 %v2460_v19, %v2366_v58  ;;  %v1073_v45 = vsub.f32 %v2463_v20, %v2366_v58 }
 0x1bd   :  { %1141 = vst [vmem:[%s2767_s2 + $0x108] sm:$0xff] %v1041_v46  ;;  %1143 = vst [vmem:[%s2767_s2 + $0x118] sm:$0xff] %v1043_v2  ;;  %v1075_v7 = vsub.f32 %v2466_v37, %v2366_v58  ;;  %v1077_v40 = vsub.f32 %v2469_v33, %v2366_v58  ;;  %v1079_v44 = vsub.f32 %v2472_v6, %v2366_v58 }
 0x1be   :  { %1145 = vst [vmem:[%s2767_s2 + $0x128] sm:$0xff] %v1045_v31  ;;  %1147 = vst [vmem:[%s2767_s2 + $0x138] sm:$0xff] %v1047_v11  ;;  %v1081_v52 = vsub.f32 %v2475_v51, %v2366_v58  ;;  %v1083_v60 = vsub.f32 %v2478_v5, %v2366_v58  ;;  %v1085_v19 = vsub.f32 %v2481_v62, %v2366_v58 }
 0x1bf   :  { %1149 = vst [vmem:[%s2767_s2 + $0x148] sm:$0xff] %v1049_v14  ;;  %1151 = vst [vmem:[%s2767_s2 + $0x158] sm:$0xff] %v1051_v32  ;;  %v1087_v20 = vsub.f32 %v2484_v43, %v2366_v58  ;;  %v1089_v37 = vsub.f32 %v2487_v16, %v2366_v58  ;;  %v1091_v33 = vsub.f32 %v2490_v59, %v2366_v58 }
 0x1c0   :  { %1153 = vst [vmem:[%s2767_s2 + $0x168] sm:$0xff] %v1053_v22  ;;  %1155 = vst [vmem:[%s2767_s2 + $0x178] sm:$0xff] %v1055_v3  ;;  %v1093_v6 = vsub.f32 %v2493_v15, %v2366_v58  ;;  %v1095_v51 = vsub.f32 %v2496_v1, %v2366_v58  ;;  %v1097_v5 = vsub.f32 %v2499_v55, %v2366_v58 }
 0x1c1   :  { %1157 = vst [vmem:[%s2767_s2 + $0x188] sm:$0xff] %v1057_v25  ;;  %1159 = vst [vmem:[%s2767_s2 + $0x198] sm:$0xff] %v1059_v63  ;;  %v1099_v62 = vsub.f32 %v2502_v48, %v2366_v58  ;;  %v1101_v43 = vsub.f32 %v2505_v4, %v2366_v58  ;;  %v1103_v16 = vsub.f32 %v2508_v34, %v2366_v58 }
 0x1c2   :  { %1161 = vst [vmem:[%s2767_s2 + $0x1a8] sm:$0xff] %v1061_v24  ;;  %1163 = vst [vmem:[%s2767_s2 + $0x1b8] sm:$0xff] %v1063_v41  ;;  %v1105_v59 = vsub.f32 %v2511_v42, %v2366_v58  ;;  %v1107_v15 = vsub.f32 %v2514_v35, %v2366_v58 }
 0x1c3   :  { %1165 = vst [vmem:[%s2767_s2 + $0x1c8] sm:$0xff] %v1065_v49  ;;  %1167 = vst [vmem:[%s2767_s2 + $0x1d8] sm:$0xff] %v1067_v57 }
 0x1c4   :  { %1169 = vst [vmem:[%s2767_s2 + $0x1e8] sm:$0xff] %v1069_v9  ;;  %1171 = vst [vmem:[%s2767_s2 + $0x1f8] sm:$0xff] %v1071_v47 }
 0x1c5   :  { %1173 = vst [vmem:[%s2767_s2 + $0x208] sm:$0xff] %v1073_v45  ;;  %1175 = vst [vmem:[%s2767_s2 + $0x218] sm:$0xff] %v1075_v7 }
 0x1c6   :  { %1177 = vst [vmem:[%s2767_s2 + $0x228] sm:$0xff] %v1077_v40  ;;  %1179 = vst [vmem:[%s2767_s2 + $0x238] sm:$0xff] %v1079_v44 }
 0x1c7   :  { %1181 = vst [vmem:[%s2767_s2 + $0x248] sm:$0xff] %v1081_v52  ;;  %1183 = vst [vmem:[%s2767_s2 + $0x258] sm:$0xff] %v1083_v60 }
 0x1c8   :  { %1185 = vst [vmem:[%s2767_s2 + $0x268] sm:$0xff] %v1085_v19  ;;  %1187 = vst [vmem:[%s2767_s2 + $0x278] sm:$0xff] %v1087_v20 }
 0x1c9   :  { %1189 = vst [vmem:[%s2767_s2 + $0x288] sm:$0xff] %v1089_v37  ;;  %1191 = vst [vmem:[%s2767_s2 + $0x298] sm:$0xff] %v1091_v33 }
 0x1ca   :  { %1193 = vst [vmem:[%s2767_s2 + $0x2a8] sm:$0xff] %v1093_v6  ;;  %1195 = vst [vmem:[%s2767_s2 + $0x2b8] sm:$0xff] %v1095_v51 }
 0x1cb   :  { %1197 = vst [vmem:[%s2767_s2 + $0x2c8] sm:$0xff] %v1097_v5  ;;  %1199 = vst [vmem:[%s2767_s2 + $0x2d8] sm:$0xff] %v1099_v62 }
 0x1cc   :  { %1201 = vst [vmem:[%s2767_s2 + $0x2e8] sm:$0xff] %v1101_v43  ;;  %1203 = vst [vmem:[%s2767_s2 + $0x2f8] sm:$0xff] %v1103_v16 }
 0x1cd   :  { %1205 = vst [vmem:[%s2767_s2 + $0x308] sm:$0xff] %v1105_v59  ;;  %1207 = vst [vmem:[%s2767_s2 + $0x318] sm:$0xff] %v1107_v15 }

</bundles_post_ra>
